<compile_context>
chip_gen: v5e
topology: v5e:2x2
jax: 0.10.0
libtpu: 0.0.40
codegen_flags: <defaults>
</compile_context>

<pallas_src>
import functools

import jax
import jax.numpy as jnp
from jax.experimental import pallas as pl
from jax.experimental.pallas import tpu as pltpu


NEG_SLOPE = 0.2       # PyG GATConv default negative_slope
MASK_BIAS = -1e30     # additive bias for non-edges (exp underflows to 0)


# ----------------------------- kernels --------------------------------------


def _make_fused_gat_kernel(heads: int, out_c: int, *, fuse_mlp: bool,
                           apply_elu: bool):
    """One grid step produces a (TILE_ROWS, heads*out_c) slab of target rows."""

    def kernel(*refs):
        if fuse_mlp:
            (x_full_ref, x_tile_ref, mw_ref, mb_ref,
             w_ref, aw_ref, b_ref, bias_ref, o_ref) = refs
        else:
            (x_full_ref, x_tile_ref,
             w_ref, aw_ref, b_ref, bias_ref, o_ref) = refs

        xf = x_full_ref[...]                      # [N, Fin]   (source nodes)
        xt = x_tile_ref[...]                      # [TR, Fin]  (target rows)
        if fuse_mlp:                              # fused Linear + ReLU
            mw = mw_ref[...].astype(jnp.bfloat16)
            mb = mb_ref[...]
            xf = jnp.maximum(
                jnp.dot(xf.astype(jnp.bfloat16), mw,
                        preferred_element_type=jnp.float32) + mb, 0.0)
            xt = jnp.maximum(
                jnp.dot(xt.astype(jnp.bfloat16), mw,
                        preferred_element_type=jnp.float32) + mb, 0.0)

        xf16 = xf.astype(jnp.bfloat16)
        xt16 = xt.astype(jnp.bfloat16)
        w16 = w_ref[...].astype(jnp.bfloat16)     # [Fin, H*C]   wide weights
        aw16 = aw_ref[...].astype(jnp.bfloat16)   # [Fin, 2H]    (src | dst)

        h_all = jnp.dot(xf16, w16, preferred_element_type=jnp.float32)    # [N, H*C]
        h_all16 = h_all.astype(jnp.bfloat16)
        aa_all = jnp.dot(xf16, aw16, preferred_element_type=jnp.float32)  # [N, 2H]
        aa_t = jnp.dot(xt16, aw16, preferred_element_type=jnp.float32)    # [TR, 2H]
        a_src_t = aa_all[:, :heads].T             # [H, N] -- single XLU transpose
        bias = bias_ref[...].astype(jnp.float32)  # [TR, N] additive 0 / -1e30

        outs = []
        for h in range(heads):                    # static, tiny head count
            # e[i, j] = leaky_relu(a_dst[i] + a_src[j]) + mask_bias[i, j]
            e = aa_t[:, heads + h:heads + h + 1] + a_src_t[h:h + 1, :]
            e = jnp.where(e > 0.0, e, NEG_SLOPE * e)
            e = e + bias
            m = jnp.max(e, axis=-1, keepdims=True)
            p = jnp.exp(e - m)                    # masked entries underflow to 0
            s = jnp.sum(p, axis=-1, keepdims=True)
            agg = jnp.dot(p.astype(jnp.bfloat16),
                          h_all16[:, h * out_c:(h + 1) * out_c],
                          preferred_element_type=jnp.float32)             # [TR, C]
            oh = agg * pl.reciprocal(s, approx=True)      # normalize post-agg
            oh = oh + b_ref[:, h * out_c:(h + 1) * out_c]
            if apply_elu:
                oh = jnp.where(oh > 0.0, oh,
                               jnp.exp(jnp.minimum(oh, 0.0)) - 1.0)
            outs.append(oh)

        out = outs[0] if heads == 1 else jnp.concatenate(outs, axis=-1)
        o_ref[...] = out.astype(o_ref.dtype)      # single lane-dense store

    return kernel


# ----------------------------- wrappers --------------------------------------


def _full_spec(shape):
    return pl.BlockSpec(shape, lambda i: (0,) * len(shape))


def _pick_tile_rows(n: int, max_tile: int) -> int:
    """Largest multiple of 16 (bf16-packing safe) <= max_tile that divides n."""
    if n <= max_tile:
        return n
    t = max_tile - (max_tile % 16)
    while t >= 16:
        if n % t == 0:
            return t
        t -= 16
    return n  # fallback: no tiling


def _gat_layer_call(x, w_all, aw, b, adj_bias, *, heads, out_c, apply_elu,
                    mlp_w=None, mlp_b=None, max_tile_rows=256):
    n, fin = x.shape
    tr = _pick_tile_rows(n, max_tile_rows)
    fuse_mlp = mlp_w is not None
    kernel = _make_fused_gat_kernel(heads, out_c, fuse_mlp=fuse_mlp,
                                    apply_elu=apply_elu)

    in_specs = [_full_spec(x.shape),                               # x, all nodes
                pl.BlockSpec((tr, fin), lambda i: (i, 0))]         # x, row tile
    args = [x, x]
    if fuse_mlp:
        in_specs += [_full_spec(mlp_w.shape), _full_spec(mlp_b.shape)]
        args += [mlp_w, mlp_b]
    in_specs += [_full_spec(w_all.shape), _full_spec(aw.shape),
                 _full_spec(b.shape),
                 pl.BlockSpec((tr, n), lambda i: (i, 0))]          # adj-bias tile
    args += [w_all, aw, b, adj_bias]

    return pl.pallas_call(
        kernel,
        out_shape=jax.ShapeDtypeStruct((n, heads * out_c), jnp.float32),
        grid=(n // tr,),
        in_specs=in_specs,
        out_specs=pl.BlockSpec((tr, heads * out_c), lambda i: (i, 0)),
        compiler_params=pltpu.CompilerParams(
            dimension_semantics=("parallel",)),   # both TCs on v7x
    )(*args)


@functools.partial(jax.jit,
                   static_argnames=("heads", "hidden", "num_classes",
                                    "max_tile_rows"))
def gat_pre_forward(params, x, adj_bias, *, heads, hidden, num_classes,
                    max_tile_rows=256):
    # ---- parameter prep (plain JAX, folded into the jit; tiny) ----
    fm = params["mlp_w"].shape[1]
    # conv1: wide per-head weight [Fm, H*C1]; attention vectors folded into one
    # [Fm, 2H] projection (H source columns, then H target columns).
    w1_all = jnp.transpose(params["w1"], (1, 0, 2)).reshape(fm, heads * hidden)
    a1_src = jnp.einsum("hfc,hc->fh", params["w1"], params["asrc1"])
    a1_dst = jnp.einsum("hfc,hc->fh", params["w1"], params["adst1"])
    aw1 = jnp.concatenate([a1_src, a1_dst], axis=1)                # [Fm, 2H]
    # conv2 (single head)
    w2_all = params["w2"][0]                                       # [H*C1, C2]
    a2_src = jnp.einsum("hfc,hc->fh", params["w2"], params["asrc2"])
    a2_dst = jnp.einsum("hfc,hc->fh", params["w2"], params["adst2"])
    aw2 = jnp.concatenate([a2_src, a2_dst], axis=1)                # [H*C1, 2]

    # layer 1: fused Linear+ReLU -> GATConv(heads) -> ELU  (dropout = identity)
    z1 = _gat_layer_call(x, w1_all, aw1, params["b1"], adj_bias,
                         heads=heads, out_c=hidden, apply_elu=True,
                         mlp_w=params["mlp_w"], mlp_b=params["mlp_b"],
                         max_tile_rows=max_tile_rows)
    # layer 2: GATConv(1 head).
    # TODO(synk): cross-layer fusion would require all-node conv1 output per
    # tile (recompute); kept as a second row-tiled call instead.
    out = _gat_layer_call(z1, w2_all, aw2, params["b2"], adj_bias,
                          heads=1, out_c=num_classes, apply_elu=False,
                          max_tile_rows=max_tile_rows)
    return out


# ----------------------------- main ------------------------------------------

if __name__ == "__main__":
    N = 32                 # nodes
    NUM_FEATURES = 4
    MLP_HIDDEN = 32
    HIDDEN = 8
    HEADS = 2
    NUM_CLASSES = 4
    NUM_EDGES = 96

    key = jax.random.PRNGKey(0)
    (k_x, k_src, k_dst, k_mw, k_mb,
     k_w1, k_a1s, k_a1d, k_w2, k_a2s, k_a2d) = jax.random.split(key, 11)

    x = jax.random.normal(k_x, (N, NUM_FEATURES), dtype=jnp.float32)
    src = jax.random.randint(k_src, (NUM_EDGES,), 0, N)
    dst = jax.random.randint(k_dst, (NUM_EDGES,), 0, N)
    edge_index = jnp.stack([src, dst])            # [2, E]

    # Dense mask: adj[i, j] = 1 iff edge j -> i, plus self loops (PyG default
    # add_self_loops=True).  Self loops guarantee every softmax row has at
    # least one live entry, so the masked softmax never hits 0/0.
    adj = jnp.zeros((N, N), jnp.float32).at[edge_index[1], edge_index[0]].set(1.0)
    adj = jnp.maximum(adj, jnp.eye(N, dtype=jnp.float32))
    # Additive attention-mask bias in bf16 (halves adj HBM / VMEM traffic).
    adj_bias = jnp.where(adj > 0.0, 0.0, MASK_BIAS).astype(jnp.bfloat16)

    def glorot(k, shape):
        fan = shape[-2] + shape[-1] if len(shape) >= 2 else shape[-1] + 1
        lim = jnp.sqrt(6.0 / fan)
        return jax.random.uniform(k, shape, jnp.float32, -lim, lim)

    params = {
        # nn.Linear(num_features, mlp_hidden)
        "mlp_w": glorot(k_mw, (NUM_FEATURES, MLP_HIDDEN)),
        "mlp_b": glorot(k_mb, (1, MLP_HIDDEN)),
        # GATConv(mlp_hidden -> hidden, heads=HEADS)
        "w1": glorot(k_w1, (HEADS, MLP_HIDDEN, HIDDEN)),
        "asrc1": glorot(k_a1s, (HEADS, HIDDEN)),
        "adst1": glorot(k_a1d, (HEADS, HIDDEN)),
        "b1": jnp.zeros((1, HEADS * HIDDEN), jnp.float32),
        # GATConv(hidden*heads -> num_classes, heads=1)
        "w2": glorot(k_w2, (1, HIDDEN * HEADS, NUM_CLASSES)),
        "asrc2": glorot(k_a2s, (1, NUM_CLASSES)),
        "adst2": glorot(k_a2d, (1, NUM_CLASSES)),
        "b2": jnp.zeros((1, NUM_CLASSES), jnp.float32),
    }

    out = gat_pre_forward(params, x, adj_bias,
                          heads=HEADS, hidden=HIDDEN, num_classes=NUM_CLASSES,
                          max_tile_rows=16)   # tile=16 -> grid=(2,), exercises tiling
    out = jax.block_until_ready(out)
    assert out.shape == (N, NUM_CLASSES), out.shape
    assert bool(jnp.all(jnp.isfinite(out)))
    print("KERNEL_OK")
</pallas_src>

<mosaic_0001>
module attributes {stable_mosaic.version = 11 : i64} {
  func.func @kernel(%arg0: i32, %arg1: memref<32x16xf32, #tpu.memory_space<vmem>>, %arg2: memref<16x16xf32, #tpu.memory_space<vmem>>, %arg3: memref<16x4xf32, #tpu.memory_space<vmem>>, %arg4: memref<16x2xf32, #tpu.memory_space<vmem>>, %arg5: memref<1x4xf32, #tpu.memory_space<vmem>>, %arg6: memref<16x32xbf16, #tpu.memory_space<vmem>>, %arg7: memref<16x4xf32, #tpu.memory_space<vmem>>) attributes {dimension_semantics = [#tpu.dimension_semantics<parallel>], iteration_bounds = array<i64: 2>, scalar_prefetch = 0 : i64, scratch_operands = 0 : i64, tpu.core_type = #tpu.core_type<tc>, window_params = [{pipeline_mode = #tpu.pipeline_mode<synchronous>, transform_indices = @transform_0, window_bounds = array<i64: 32, 16>}, {transform_indices = @transform_1, window_bounds = array<i64: 16, 16>}, {pipeline_mode = #tpu.pipeline_mode<synchronous>, transform_indices = @transform_2, window_bounds = array<i64: 16, 4>}, {pipeline_mode = #tpu.pipeline_mode<synchronous>, transform_indices = @transform_3, window_bounds = array<i64: 16, 2>}, {pipeline_mode = #tpu.pipeline_mode<synchronous>, transform_indices = @transform_4, window_bounds = array<i64: 1, 4>}, {transform_indices = @transform_5, window_bounds = array<i64: 16, 32>}, {transform_indices = @transform_6, window_bounds = array<i64: 16, 4>}]} {
    %c0 = arith.constant 0 : index
    %c0_0 = arith.constant 0 : index
    %0 = vector.load %arg1[%c0, %c0_0] : memref<32x16xf32, #tpu.memory_space<vmem>>, vector<32x16xf32>
    %c0_1 = arith.constant 0 : index
    %c0_2 = arith.constant 0 : index
    %1 = vector.load %arg2[%c0_1, %c0_2] : memref<16x16xf32, #tpu.memory_space<vmem>>, vector<16x16xf32>
    %2 = arith.truncf %0 : vector<32x16xf32> to vector<32x16xbf16>
    %3 = arith.truncf %1 : vector<16x16xf32> to vector<16x16xbf16>
    %c0_3 = arith.constant 0 : index
    %c0_4 = arith.constant 0 : index
    %4 = vector.load %arg3[%c0_3, %c0_4] : memref<16x4xf32, #tpu.memory_space<vmem>>, vector<16x4xf32>
    %5 = arith.truncf %4 : vector<16x4xf32> to vector<16x4xbf16>
    %c0_5 = arith.constant 0 : index
    %c0_6 = arith.constant 0 : index
    %6 = vector.load %arg4[%c0_5, %c0_6] : memref<16x2xf32, #tpu.memory_space<vmem>>, vector<16x2xf32>
    %7 = arith.truncf %6 : vector<16x2xf32> to vector<16x2xbf16>
    %cst = arith.constant dense<0.000000e+00> : vector<32x4xf32>
    %8 = tpu.matmul %2, %5, %cst {dimension_numbers = #tpu.dot_dimension_numbers<[1], [0], [0], [1], [0, 0, 1, 1], [], []>} : vector<32x16xbf16>, vector<16x4xbf16>, vector<32x4xf32> -> vector<32x4xf32>
    %9 = arith.truncf %8 : vector<32x4xf32> to vector<32x4xbf16>
    %cst_7 = arith.constant dense<0.000000e+00> : vector<32x2xf32>
    %10 = tpu.matmul %2, %7, %cst_7 {dimension_numbers = #tpu.dot_dimension_numbers<[1], [0], [0], [1], [0, 0, 1, 1], [], []>} : vector<32x16xbf16>, vector<16x2xbf16>, vector<32x2xf32> -> vector<32x2xf32>
    %cst_8 = arith.constant dense<0.000000e+00> : vector<16x2xf32>
    %11 = tpu.matmul %3, %7, %cst_8 {dimension_numbers = #tpu.dot_dimension_numbers<[1], [0], [0], [1], [0, 0, 1, 1], [], []>} : vector<16x16xbf16>, vector<16x2xbf16>, vector<16x2xf32> -> vector<16x2xf32>
    %12 = vector.extract_strided_slice %10 {offsets = [0, 0], sizes = [32, 1], strides = [1, 1]} : vector<32x2xf32> to vector<32x1xf32>
    %13 = tpu.transpose %12, [1, 0] : vector<32x1xf32> -> vector<1x32xf32>
    %c0_9 = arith.constant 0 : index
    %c0_10 = arith.constant 0 : index
    %14 = vector.load %arg6[%c0_9, %c0_10] : memref<16x32xbf16, #tpu.memory_space<vmem>>, vector<16x32xbf16>
    %15 = arith.extf %14 : vector<16x32xbf16> to vector<16x32xf32>
    %16 = vector.extract_strided_slice %11 {offsets = [0, 1], sizes = [16, 1], strides = [1, 1]} : vector<16x2xf32> to vector<16x1xf32>
    %17 = vector.broadcast %16 : vector<16x1xf32> to vector<16x32xf32>
    %18 = vector.broadcast %13 : vector<1x32xf32> to vector<16x32xf32>
    %19 = arith.addf %17, %18 : vector<16x32xf32>
    %cst_11 = arith.constant 0.000000e+00 : f32
    %20 = vector.broadcast %cst_11 : f32 to vector<16x32xf32>
    %21 = arith.cmpf ogt, %19, %20 : vector<16x32xf32>
    %cst_12 = arith.constant 2.000000e-01 : f32
    %22 = vector.broadcast %cst_12 : f32 to vector<16x32xf32>
    %23 = arith.mulf %22, %19 : vector<16x32xf32>
    %24 = arith.select %21, %19, %23 : vector<16x32xi1>, vector<16x32xf32>
    %25 = arith.addf %24, %15 : vector<16x32xf32>
    %cst_13 = arith.constant dense<0xFF800000> : vector<16xf32>
    %26 = vector.multi_reduction <maximumf>, %25, %cst_13 [1] : vector<16x32xf32> to vector<16xf32>
    %27 = vector.shape_cast %26 : vector<16xf32> to vector<16x1xf32>
    %28 = vector.broadcast %27 : vector<16x1xf32> to vector<16x32xf32>
    %29 = arith.subf %25, %28 : vector<16x32xf32>
    %30 = math.exp %29 : vector<16x32xf32>
    %cst_14 = arith.constant dense<0.000000e+00> : vector<16xf32>
    %31 = vector.multi_reduction <add>, %30, %cst_14 [1] : vector<16x32xf32> to vector<16xf32>
    %32 = vector.shape_cast %31 : vector<16xf32> to vector<16x1xf32>
    %33 = arith.truncf %30 : vector<16x32xf32> to vector<16x32xbf16>
    %cst_15 = arith.constant dense<0.000000e+00> : vector<16x4xf32>
    %34 = tpu.matmul %33, %9, %cst_15 {dimension_numbers = #tpu.dot_dimension_numbers<[1], [0], [0], [1], [0, 0, 1, 1], [], []>} : vector<16x32xbf16>, vector<32x4xbf16>, vector<16x4xf32> -> vector<16x4xf32>
    %35 = tpu.reciprocal %32 {approx = true} : vector<16x1xf32> -> vector<16x1xf32>
    %36 = vector.broadcast %35 : vector<16x1xf32> to vector<16x4xf32>
    %37 = arith.mulf %34, %36 : vector<16x4xf32>
    %c0_16 = arith.constant 0 : index
    %c0_17 = arith.constant 0 : index
    %38 = vector.load %arg5[%c0_16, %c0_17] : memref<1x4xf32, #tpu.memory_space<vmem>>, vector<1x4xf32>
    %39 = vector.broadcast %38 : vector<1x4xf32> to vector<16x4xf32>
    %40 = arith.addf %37, %39 : vector<16x4xf32>
    %c0_18 = arith.constant 0 : index
    %c0_19 = arith.constant 0 : index
    %41 = vector.load %arg7[%c0_18, %c0_19] : memref<16x4xf32, #tpu.memory_space<vmem>>, vector<16x4xf32>
    tpu.vector_store %arg7[%c0_18, %c0_19], %40 {strides = array<i32>} : memref<16x4xf32, #tpu.memory_space<vmem>>, vector<16x4xf32>,
    return
  }
  func.func @transform_0(%arg0: i32) -> (i32, i32) {
    %c0_i32 = arith.constant 0 : i32
    %c0_i32_0 = arith.constant 0 : i32
    %c0_i32_1 = arith.constant 0 : i32
    return %c0_i32, %c0_i32_0 : i32, i32
  }
  func.func @transform_1(%arg0: i32) -> (i32, i32) {
    %c0_i32 = arith.constant 0 : i32
    %c0_i32_0 = arith.constant 0 : i32
    return %arg0, %c0_i32 : i32, i32
  }
  func.func @transform_2(%arg0: i32) -> (i32, i32) {
    %c0_i32 = arith.constant 0 : i32
    %c0_i32_0 = arith.constant 0 : i32
    %c0_i32_1 = arith.constant 0 : i32
    return %c0_i32, %c0_i32_0 : i32, i32
  }
  func.func @transform_3(%arg0: i32) -> (i32, i32) {
    %c0_i32 = arith.constant 0 : i32
    %c0_i32_0 = arith.constant 0 : i32
    %c0_i32_1 = arith.constant 0 : i32
    return %c0_i32, %c0_i32_0 : i32, i32
  }
  func.func @transform_4(%arg0: i32) -> (i32, i32) {
    %c0_i32 = arith.constant 0 : i32
    %c0_i32_0 = arith.constant 0 : i32
    %c0_i32_1 = arith.constant 0 : i32
    return %c0_i32, %c0_i32_0 : i32, i32
  }
  func.func @transform_5(%arg0: i32) -> (i32, i32) {
    %c0_i32 = arith.constant 0 : i32
    %c0_i32_0 = arith.constant 0 : i32
    return %arg0, %c0_i32 : i32, i32
  }
  func.func @transform_6(%arg0: i32) -> (i32, i32) {
    %c0_i32 = arith.constant 0 : i32
    %c0_i32_0 = arith.constant 0 : i32
    return %arg0, %c0_i32 : i32, i32
  }
}

module attributes {stable_mosaic.version = 11 : i64} {
  func.func @kernel(%arg0: i32, %arg1: memref<32x4xf32, #tpu.memory_space<vmem>>, %arg2: memref<16x4xf32, #tpu.memory_space<vmem>>, %arg3: memref<4x32xf32, #tpu.memory_space<vmem>>, %arg4: memref<1x32xf32, #tpu.memory_space<vmem>>, %arg5: memref<32x16xf32, #tpu.memory_space<vmem>>, %arg6: memref<32x4xf32, #tpu.memory_space<vmem>>, %arg7: memref<1x16xf32, #tpu.memory_space<vmem>>, %arg8: memref<16x32xbf16, #tpu.memory_space<vmem>>, %arg9: memref<16x16xf32, #tpu.memory_space<vmem>>) attributes {dimension_semantics = [#tpu.dimension_semantics<parallel>], iteration_bounds = array<i64: 2>, scalar_prefetch = 0 : i64, scratch_operands = 0 : i64, tpu.core_type = #tpu.core_type<tc>, window_params = [{pipeline_mode = #tpu.pipeline_mode<synchronous>, transform_indices = @transform_0, window_bounds = array<i64: 32, 4>}, {transform_indices = @transform_1, window_bounds = array<i64: 16, 4>}, {pipeline_mode = #tpu.pipeline_mode<synchronous>, transform_indices = @transform_2, window_bounds = array<i64: 4, 32>}, {pipeline_mode = #tpu.pipeline_mode<synchronous>, transform_indices = @transform_3, window_bounds = array<i64: 1, 32>}, {pipeline_mode = #tpu.pipeline_mode<synchronous>, transform_indices = @transform_4, window_bounds = array<i64: 32, 16>}, {pipeline_mode = #tpu.pipeline_mode<synchronous>, transform_indices = @transform_5, window_bounds = array<i64: 32, 4>}, {pipeline_mode = #tpu.pipeline_mode<synchronous>, transform_indices = @transform_6, window_bounds = array<i64: 1, 16>}, {transform_indices = @transform_7, window_bounds = array<i64: 16, 32>}, {transform_indices = @transform_8, window_bounds = array<i64: 16, 16>}]} {
    %c0 = arith.constant 0 : index
    %c0_0 = arith.constant 0 : index
    %0 = vector.load %arg1[%c0, %c0_0] : memref<32x4xf32, #tpu.memory_space<vmem>>, vector<32x4xf32>
    %c0_1 = arith.constant 0 : index
    %c0_2 = arith.constant 0 : index
    %1 = vector.load %arg2[%c0_1, %c0_2] : memref<16x4xf32, #tpu.memory_space<vmem>>, vector<16x4xf32>
    %c0_3 = arith.constant 0 : index
    %c0_4 = arith.constant 0 : index
    %2 = vector.load %arg3[%c0_3, %c0_4] : memref<4x32xf32, #tpu.memory_space<vmem>>, vector<4x32xf32>
    %3 = arith.truncf %2 : vector<4x32xf32> to vector<4x32xbf16>
    %c0_5 = arith.constant 0 : index
    %c0_6 = arith.constant 0 : index
    %4 = vector.load %arg4[%c0_5, %c0_6] : memref<1x32xf32, #tpu.memory_space<vmem>>, vector<1x32xf32>
    %5 = arith.truncf %0 : vector<32x4xf32> to vector<32x4xbf16>
    %cst = arith.constant dense<0.000000e+00> : vector<32x32xf32>
    %6 = tpu.matmul %5, %3, %cst {dimension_numbers = #tpu.dot_dimension_numbers<[1], [0], [0], [1], [0, 0, 1, 1], [], []>} : vector<32x4xbf16>, vector<4x32xbf16>, vector<32x32xf32> -> vector<32x32xf32>
    %7 = vector.broadcast %4 : vector<1x32xf32> to vector<32x32xf32>
    %8 = arith.addf %6, %7 : vector<32x32xf32>
    %cst_7 = arith.constant 0.000000e+00 : f32
    %9 = vector.broadcast %cst_7 : f32 to vector<32x32xf32>
    %10 = arith.maximumf %8, %9 : vector<32x32xf32>
    %11 = arith.truncf %1 : vector<16x4xf32> to vector<16x4xbf16>
    %cst_8 = arith.constant dense<0.000000e+00> : vector<16x32xf32>
    %12 = tpu.matmul %11, %3, %cst_8 {dimension_numbers = #tpu.dot_dimension_numbers<[1], [0], [0], [1], [0, 0, 1, 1], [], []>} : vector<16x4xbf16>, vector<4x32xbf16>, vector<16x32xf32> -> vector<16x32xf32>
    %13 = vector.broadcast %4 : vector<1x32xf32> to vector<16x32xf32>
    %14 = arith.addf %12, %13 : vector<16x32xf32>
    %cst_9 = arith.constant 0.000000e+00 : f32
    %15 = vector.broadcast %cst_9 : f32 to vector<16x32xf32>
    %16 = arith.maximumf %14, %15 : vector<16x32xf32>
    %17 = arith.truncf %10 : vector<32x32xf32> to vector<32x32xbf16>
    %18 = arith.truncf %16 : vector<16x32xf32> to vector<16x32xbf16>
    %c0_10 = arith.constant 0 : index
    %c0_11 = arith.constant 0 : index
    %19 = vector.load %arg5[%c0_10, %c0_11] : memref<32x16xf32, #tpu.memory_space<vmem>>, vector<32x16xf32>
    %20 = arith.truncf %19 : vector<32x16xf32> to vector<32x16xbf16>
    %c0_12 = arith.constant 0 : index
    %c0_13 = arith.constant 0 : index
    %21 = vector.load %arg6[%c0_12, %c0_13] : memref<32x4xf32, #tpu.memory_space<vmem>>, vector<32x4xf32>
    %22 = arith.truncf %21 : vector<32x4xf32> to vector<32x4xbf16>
    %cst_14 = arith.constant dense<0.000000e+00> : vector<32x16xf32>
    %23 = tpu.matmul %17, %20, %cst_14 {dimension_numbers = #tpu.dot_dimension_numbers<[1], [0], [0], [1], [0, 0, 1, 1], [], []>} : vector<32x32xbf16>, vector<32x16xbf16>, vector<32x16xf32> -> vector<32x16xf32>
    %24 = arith.truncf %23 : vector<32x16xf32> to vector<32x16xbf16>
    %cst_15 = arith.constant dense<0.000000e+00> : vector<32x4xf32>
    %25 = tpu.matmul %17, %22, %cst_15 {dimension_numbers = #tpu.dot_dimension_numbers<[1], [0], [0], [1], [0, 0, 1, 1], [], []>} : vector<32x32xbf16>, vector<32x4xbf16>, vector<32x4xf32> -> vector<32x4xf32>
    %cst_16 = arith.constant dense<0.000000e+00> : vector<16x4xf32>
    %26 = tpu.matmul %18, %22, %cst_16 {dimension_numbers = #tpu.dot_dimension_numbers<[1], [0], [0], [1], [0, 0, 1, 1], [], []>} : vector<16x32xbf16>, vector<32x4xbf16>, vector<16x4xf32> -> vector<16x4xf32>
    %27 = vector.extract_strided_slice %25 {offsets = [0, 0], sizes = [32, 2], strides = [1, 1]} : vector<32x4xf32> to vector<32x2xf32>
    %28 = tpu.transpose %27, [1, 0] : vector<32x2xf32> -> vector<2x32xf32>
    %c0_17 = arith.constant 0 : index
    %c0_18 = arith.constant 0 : index
    %29 = vector.load %arg8[%c0_17, %c0_18] : memref<16x32xbf16, #tpu.memory_space<vmem>>, vector<16x32xbf16>
    %30 = arith.extf %29 : vector<16x32xbf16> to vector<16x32xf32>
    %31 = vector.extract_strided_slice %26 {offsets = [0, 2], sizes = [16, 1], strides = [1, 1]} : vector<16x4xf32> to vector<16x1xf32>
    %32 = vector.extract_strided_slice %28 {offsets = [0, 0], sizes = [1, 32], strides = [1, 1]} : vector<2x32xf32> to vector<1x32xf32>
    %33 = vector.broadcast %31 : vector<16x1xf32> to vector<16x32xf32>
    %34 = vector.broadcast %32 : vector<1x32xf32> to vector<16x32xf32>
    %35 = arith.addf %33, %34 : vector<16x32xf32>
    %cst_19 = arith.constant 0.000000e+00 : f32
    %36 = vector.broadcast %cst_19 : f32 to vector<16x32xf32>
    %37 = arith.cmpf ogt, %35, %36 : vector<16x32xf32>
    %cst_20 = arith.constant 2.000000e-01 : f32
    %38 = vector.broadcast %cst_20 : f32 to vector<16x32xf32>
    %39 = arith.mulf %38, %35 : vector<16x32xf32>
    %40 = arith.select %37, %35, %39 : vector<16x32xi1>, vector<16x32xf32>
    %41 = arith.addf %40, %30 : vector<16x32xf32>
    %cst_21 = arith.constant dense<0xFF800000> : vector<16xf32>
    %42 = vector.multi_reduction <maximumf>, %41, %cst_21 [1] : vector<16x32xf32> to vector<16xf32>
    %43 = vector.shape_cast %42 : vector<16xf32> to vector<16x1xf32>
    %44 = vector.broadcast %43 : vector<16x1xf32> to vector<16x32xf32>
    %45 = arith.subf %41, %44 : vector<16x32xf32>
    %46 = math.exp %45 : vector<16x32xf32>
    %cst_22 = arith.constant dense<0.000000e+00> : vector<16xf32>
    %47 = vector.multi_reduction <add>, %46, %cst_22 [1] : vector<16x32xf32> to vector<16xf32>
    %48 = vector.shape_cast %47 : vector<16xf32> to vector<16x1xf32>
    %49 = arith.truncf %46 : vector<16x32xf32> to vector<16x32xbf16>
    %50 = vector.extract_strided_slice %24 {offsets = [0, 0], sizes = [32, 8], strides = [1, 1]} : vector<32x16xbf16> to vector<32x8xbf16>
    %cst_23 = arith.constant dense<0.000000e+00> : vector<16x8xf32>
    %51 = tpu.matmul %49, %50, %cst_23 {dimension_numbers = #tpu.dot_dimension_numbers<[1], [0], [0], [1], [0, 0, 1, 1], [], []>} : vector<16x32xbf16>, vector<32x8xbf16>, vector<16x8xf32> -> vector<16x8xf32>
    %52 = tpu.reciprocal %48 {approx = true} : vector<16x1xf32> -> vector<16x1xf32>
    %53 = vector.broadcast %52 : vector<16x1xf32> to vector<16x8xf32>
    %54 = arith.mulf %51, %53 : vector<16x8xf32>
    %c0_24 = arith.constant 0 : index
    %c0_25 = arith.constant 0 : index
    %55 = vector.load %arg7[%c0_24, %c0_25] : memref<1x16xf32, #tpu.memory_space<vmem>>, vector<1x8xf32>
    %56 = vector.broadcast %55 : vector<1x8xf32> to vector<16x8xf32>
    %57 = arith.addf %54, %56 : vector<16x8xf32>
    %cst_26 = arith.constant 0.000000e+00 : f32
    %58 = vector.broadcast %cst_26 : f32 to vector<16x8xf32>
    %59 = arith.cmpf ogt, %57, %58 : vector<16x8xf32>
    %cst_27 = arith.constant 0.000000e+00 : f32
    %60 = vector.broadcast %cst_27 : f32 to vector<16x8xf32>
    %61 = arith.minimumf %57, %60 : vector<16x8xf32>
    %62 = math.exp %61 : vector<16x8xf32>
    %cst_28 = arith.constant 1.000000e+00 : f32
    %63 = vector.broadcast %cst_28 : f32 to vector<16x8xf32>
    %64 = arith.subf %62, %63 : vector<16x8xf32>
    %65 = arith.select %59, %57, %64 : vector<16x8xi1>, vector<16x8xf32>
    %66 = vector.extract_strided_slice %26 {offsets = [0, 3], sizes = [16, 1], strides = [1, 1]} : vector<16x4xf32> to vector<16x1xf32>
    %67 = vector.extract_strided_slice %28 {offsets = [1, 0], sizes = [1, 32], strides = [1, 1]} : vector<2x32xf32> to vector<1x32xf32>
    %68 = vector.broadcast %66 : vector<16x1xf32> to vector<16x32xf32>
    %69 = vector.broadcast %67 : vector<1x32xf32> to vector<16x32xf32>
    %70 = arith.addf %68, %69 : vector<16x32xf32>
    %cst_29 = arith.constant 0.000000e+00 : f32
    %71 = vector.broadcast %cst_29 : f32 to vector<16x32xf32>
    %72 = arith.cmpf ogt, %70, %71 : vector<16x32xf32>
    %cst_30 = arith.constant 2.000000e-01 : f32
    %73 = vector.broadcast %cst_30 : f32 to vector<16x32xf32>
    %74 = arith.mulf %73, %70 : vector<16x32xf32>
    %75 = arith.select %72, %70, %74 : vector<16x32xi1>, vector<16x32xf32>
    %76 = arith.addf %75, %30 : vector<16x32xf32>
    %cst_31 = arith.constant dense<0xFF800000> : vector<16xf32>
    %77 = vector.multi_reduction <maximumf>, %76, %cst_31 [1] : vector<16x32xf32> to vector<16xf32>
    %78 = vector.shape_cast %77 : vector<16xf32> to vector<16x1xf32>
    %79 = vector.broadcast %78 : vector<16x1xf32> to vector<16x32xf32>
    %80 = arith.subf %76, %79 : vector<16x32xf32>
    %81 = math.exp %80 : vector<16x32xf32>
    %cst_32 = arith.constant dense<0.000000e+00> : vector<16xf32>
    %82 = vector.multi_reduction <add>, %81, %cst_32 [1] : vector<16x32xf32> to vector<16xf32>
    %83 = vector.shape_cast %82 : vector<16xf32> to vector<16x1xf32>
    %84 = arith.truncf %81 : vector<16x32xf32> to vector<16x32xbf16>
    %85 = vector.extract_strided_slice %24 {offsets = [0, 8], sizes = [32, 8], strides = [1, 1]} : vector<32x16xbf16> to vector<32x8xbf16>
    %cst_33 = arith.constant dense<0.000000e+00> : vector<16x8xf32>
    %86 = tpu.matmul %84, %85, %cst_33 {dimension_numbers = #tpu.dot_dimension_numbers<[1], [0], [0], [1], [0, 0, 1, 1], [], []>} : vector<16x32xbf16>, vector<32x8xbf16>, vector<16x8xf32> -> vector<16x8xf32>
    %87 = tpu.reciprocal %83 {approx = true} : vector<16x1xf32> -> vector<16x1xf32>
    %88 = vector.broadcast %87 : vector<16x1xf32> to vector<16x8xf32>
    %89 = arith.mulf %86, %88 : vector<16x8xf32>
    %c0_34 = arith.constant 0 : index
    %c8 = arith.constant 8 : index
    %90 = vector.load %arg7[%c0_34, %c8] : memref<1x16xf32, #tpu.memory_space<vmem>>, vector<1x8xf32>
    %91 = vector.broadcast %90 : vector<1x8xf32> to vector<16x8xf32>
    %92 = arith.addf %89, %91 : vector<16x8xf32>
    %cst_35 = arith.constant 0.000000e+00 : f32
    %93 = vector.broadcast %cst_35 : f32 to vector<16x8xf32>
    %94 = arith.cmpf ogt, %92, %93 : vector<16x8xf32>
    %cst_36 = arith.constant 0.000000e+00 : f32
    %95 = vector.broadcast %cst_36 : f32 to vector<16x8xf32>
    %96 = arith.minimumf %92, %95 : vector<16x8xf32>
    %97 = math.exp %96 : vector<16x8xf32>
    %cst_37 = arith.constant 1.000000e+00 : f32
    %98 = vector.broadcast %cst_37 : f32 to vector<16x8xf32>
    %99 = arith.subf %97, %98 : vector<16x8xf32>
    %100 = arith.select %94, %92, %99 : vector<16x8xi1>, vector<16x8xf32>
    %101 = tpu.concatenate %65, %100 in 1 : vector<16x8xf32>, vector<16x8xf32> -> vector<16x16xf32>
    %c0_38 = arith.constant 0 : index
    %c0_39 = arith.constant 0 : index
    %102 = vector.load %arg9[%c0_38, %c0_39] : memref<16x16xf32, #tpu.memory_space<vmem>>, vector<16x16xf32>
    tpu.vector_store %arg9[%c0_38, %c0_39], %101 {strides = array<i32>} : memref<16x16xf32, #tpu.memory_space<vmem>>, vector<16x16xf32>,
    return
  }
  func.func @transform_0(%arg0: i32) -> (i32, i32) {
    %c0_i32 = arith.constant 0 : i32
    %c0_i32_0 = arith.constant 0 : i32
    %c0_i32_1 = arith.constant 0 : i32
    return %c0_i32, %c0_i32_0 : i32, i32
  }
  func.func @transform_1(%arg0: i32) -> (i32, i32) {
    %c0_i32 = arith.constant 0 : i32
    %c0_i32_0 = arith.constant 0 : i32
    return %arg0, %c0_i32 : i32, i32
  }
  func.func @transform_2(%arg0: i32) -> (i32, i32) {
    %c0_i32 = arith.constant 0 : i32
    %c0_i32_0 = arith.constant 0 : i32
    %c0_i32_1 = arith.constant 0 : i32
    return %c0_i32, %c0_i32_0 : i32, i32
  }
  func.func @transform_3(%arg0: i32) -> (i32, i32) {
    %c0_i32 = arith.constant 0 : i32
    %c0_i32_0 = arith.constant 0 : i32
    %c0_i32_1 = arith.constant 0 : i32
    return %c0_i32, %c0_i32_0 : i32, i32
  }
  func.func @transform_4(%arg0: i32) -> (i32, i32) {
    %c0_i32 = arith.constant 0 : i32
    %c0_i32_0 = arith.constant 0 : i32
    %c0_i32_1 = arith.constant 0 : i32
    return %c0_i32, %c0_i32_0 : i32, i32
  }
  func.func @transform_5(%arg0: i32) -> (i32, i32) {
    %c0_i32 = arith.constant 0 : i32
    %c0_i32_0 = arith.constant 0 : i32
    %c0_i32_1 = arith.constant 0 : i32
    return %c0_i32, %c0_i32_0 : i32, i32
  }
  func.func @transform_6(%arg0: i32) -> (i32, i32) {
    %c0_i32 = arith.constant 0 : i32
    %c0_i32_0 = arith.constant 0 : i32
    %c0_i32_1 = arith.constant 0 : i32
    return %c0_i32, %c0_i32_0 : i32, i32
  }
  func.func @transform_7(%arg0: i32) -> (i32, i32) {
    %c0_i32 = arith.constant 0 : i32
    %c0_i32_0 = arith.constant 0 : i32
    return %arg0, %c0_i32 : i32, i32
  }
  func.func @transform_8(%arg0: i32) -> (i32, i32) {
    %c0_i32 = arith.constant 0 : i32
    %c0_i32_0 = arith.constant 0 : i32
    return %arg0, %c0_i32 : i32, i32
  }
}

</mosaic_0001>

<bundles_post_ra>
// kernel: gat_pre_forward.3
= control target key start
LH: loop header
LB: loop body
LE: loop exit
PB: predicated region body
PF: predicated region fallthrough
CT: control target
= control target key end

     0   :  { %s619_s21 = smov 0   ;;  %s684_s0 = inlined_call_operand.vmem [shape: f32[32,16], index: 0, kind: input, shape index: {}, may-alias: {0,1}]   ;;  %s685_s1 = inlined_call_operand.vmem [shape: f32[32,16], index: 1, kind: input, shape index: {}, may-alias: {0,1}]   ;;  %s686_s2 = inlined_call_operand.vmem [shape: f32[16,4], index: 2, kind: input, shape index: {}]   ;;  %s687_s3 = inlined_call_operand.vmem [shape: f32[16,2], index: 3, kind: input, shape index: {}]   ;;  %s688_s4 = inlined_call_operand.vmem [shape: f32[1,4], index: 4, kind: input, shape index: {}]   ;;  %s689_s5 = inlined_call_operand.vmem [shape: bf16[32,32], index: 5, kind: input, shape index: {}]   ;;  %s690_s6 = inlined_call_operand.vmem [shape: f32[32,4], index: 6, kind: output, shape index: {}]  }
   0x1 LB: > { %s532_s22 = sadd.s32 4294967295, %s581_s21   ;;  %p536_p0 = scmp.ge.s32.totalorder %s581_s21, 1  ;;  %s581_s21 = sphi %s619_s21, %s16_s21  }
   0x2   : > { %p224_p1 = scmp.lt.s32.totalorder %s581_s21, 3 }
   0x4   : > { %p225_p2 = pnand %p536_p0, %p224_p1 }
   0x5   : > { %s537_s29 = sshll.u32 (!%p225_p2), %s532_s22, 1 }
   0x6   : > { %228 = sbr.rel (%p225_p2) target bundleno = 600 (0x258), region = 44  ;;  %p260_p3 = scmp.lt.s32.totalorder (!%p225_p2), %s537_s29, 3 }
   0xb   : > { %v290_v0 = vld [vmem:[%s687_s3] sm:$0xff]  ;;  %v291_v1 = vld [vmem:[%s687_s3 + $0x8] sm:$0xff]  ;;  %vm293_vm0 = vcmask 130048   ;;  %s692_s29 = smov (!%p260_p3, %s537_s29), 3  ;;  %v280_v9 = vld [vmem:[%s684_s0 + $0x10] sm:$0xff]  ;;  %v583_v14 = vmov 1  }
   0xc   : > { %v278_v2 = vld [vmem:[%s684_s0] sm:$0xff]  ;;  %v292_v3 = vpack.c.bf16 %v291_v1, %v290_v0  ;;  %v279_v4 = vld [vmem:[%s684_s0 + $0x8] sm:$0xff]  ;;  %s538_s8 = sshll.u32 %s692_s29, 3  ;;  %v281_v10 = vld [vmem:[%s684_s0 + $0x18] sm:$0xff]  ;;  %565 = vset.pattern.permute.xlu0 %v583_v14  ;;  %s540_s20 = sshll.u32 %s692_s29, 2  ;;  %vm414_vm2 = vcmask 261120  }
   0xd   : > { %v284_v5 = vpack.c.bf16 %v279_v4, %v278_v2  ;;  %s263_s11 = scalar_lea.vmem %s685_s1, %s538_s8  ;;  %v285_v11 = vpack.c.bf16 %v281_v10, %v280_v9  ;;  %v287_v12 = vld [vmem:[%s686_s2] sm:$0xff]  ;;  %v288_v13 = vld [vmem:[%s686_s2 + $0x8] sm:$0xff]  ;;  %s269_s24 = scalar_lea.vmem %s689_s5, %s540_s20  ;;  %vm461_vm4 = vcmask 31744  }
   0xe   : > { %328 = vmatpush.bf16.msra.mxu1 %v292_v3  ;;  %350 = vmatpush.bf16.msra.mxu2 %v292_v3  ;;  %v282_v6 = vld [vmem:[%s263_s11] sm:$0xff]  ;;  %v283_v7 = vld [vmem:[%s263_s11 + $0x8] sm:$0xff]  ;;  %v289_v15 = vpack.c.bf16 %v288_v13, %v287_v12  ;;  %s275_s30 = scalar_lea.vmem %s690_s6, %s538_s8 }
   0xf   : > { %v286_v8 = vpack.c.bf16 %v283_v7, %v282_v6  ;;  %v552_v28 = vld [vmem:[%s269_s24] sm:$0xff]  }
  0x10   : > { %307 = vmatpush.bf16.msra.mxu0 %v289_v15  ;;  %v553_v32 = vunpack.c.l.bf16 %v552_v28  ;;  %v554_v38 = vunpack.c.h.bf16 %v552_v28  ;;  %v566_v58 = vld [vmem:[%s688_s4] ss:$0 sm:$0xff] }
  0x11   : > { %545 = vmatmul.msk.bf16.vlgmr.msra.gmra.mxu1 %vm293_vm0, %v284_v5  ;;  %547 = vmatmul.msk.bf16.vlgmr.msra.gmra.mxu2 %vm293_vm0, %v286_v8 }
  0x13   : > { %543 = vmatmul.msk.bf16.vlgmr.msra.gmra.mxu0 %vm293_vm0, %v284_v5 }
  0x21   : > { %546 = vmatmul.msk.bf16.gmra.mxu1 %vm293_vm0, %v285_v11 }
  0x23   : > { %544 = vmatmul.msk.bf16.gmra.mxu0 %vm293_vm0, %v285_v11 }
  0x8e   : > { %v330_v16 = vpop.f32.mrf.mxu1 }
  0x8f   : > { %357 = vxpose.xlu1.b32.start [1/4] (short) (narrow) %v330_v16, 8 }
  0x90   : > { %v309_v22 = vpop.f32.mrf.mxu0 }
  0x94   : > { %v352_v18 = vpop.f32.mrf.mxu2 }
  0x95   : > { %395 = vperm.xlu0 %565, %v352_v18  }
  0x96   : > { %v332_v17 = vpop.f32.mrf.mxu1 }
  0x97   : > { %358 = vxpose.xlu1.b32.cont [2/4] (short) (narrow) %v332_v17, 8 }
  0x98   : > { %v311_v24 = vpop.f32.mrf.mxu0 }
  0x99   : > { %v319_v43 = vpack.c.bf16 %v311_v24, %v309_v22 }
  0x9c   : > { %v354_v20 = vpop.f32.mrf.mxu2 }
  0x9d   : > { %400 = vperm.xlu0 %565, %v354_v20  }
  0x9e   : > { %v335_v19 = vpop.f32.mrf.mxu1 }
  0x9f   : > { %359 = vxpose.xlu1.b32.cont [3/4] (short) (narrow) %v335_v19, 8 }
  0xa0   : > { %v314_v31 = vpop.f32.mrf.mxu0 }
  0xa6   : > { %v337_v21 = vpop.f32.mrf.mxu1 }
  0xa7   : > { %360 = vxpose.xlu1.b32.end [4/4] (short) (narrow) %v337_v21, 8 }
  0xa8   : > { %v316_v40 = vpop.f32.mrf.mxu0 }
  0xa9   : > { %v320_v41 = vpack.c.bf16 %v316_v40, %v314_v31 }
  0xab   : > { %443 = vmatpush.bf16.msra.mxu3 %v320_v41 }
  0xaf   : > { %444 = vmatpush.bf16.msra.mxu3 %v319_v43 }
 0x107   : > { %v396_v23 = vpop.permute.xlu0 %395 }
 0x10f   : > { %v401_v26 = vpop.permute.xlu0 %400 }
 0x133   : > { %v373_v25 = vpop.trf.xlu1 }
 0x134   : > { %v403_v27 = vperm.slane %v373_v25, 0 }
 0x136   : > { %v404_v29 = vadd.f32 %v403_v27, %v396_v23  ;;  %v405_v30 = vadd.f32 %v403_v27, %v401_v26 }
 0x138   : > { %v408_v33 = vmul.f32 0.2, %v404_v29  ;;  %vm406_vm1 = vcmp.gt.f32.partialorder %v404_v29, 0.0  ;;  %v409_v34 = vmul.f32 0.2, %v405_v30  ;;  %vm407_vm3 = vcmp.gt.f32.partialorder %v405_v30, 0.0 }
 0x13a   : > { %v410_v35 = vsel %vm406_vm1, %v404_v29, %v408_v33  ;;  %v411_v39 = vsel %vm407_vm3, %v405_v30, %v409_v34 }
 0x13b   : > { %v412_v36 = vadd.f32 %v553_v32, %v410_v35  ;;  %v413_v42 = vadd.f32 %v554_v38, %v411_v39 }
 0x13d   : > { %v415_v37 = vsel %vm414_vm2, %v412_v36, -inf  ;;  %v418_v44 = vsel %vm414_vm2, %v413_v42, -inf }
 0x13e   : > { %416 = vmax.xlane.f32.xlu2 %v415_v37 }
 0x146   : > { %419 = vmax.xlane.f32.xlu2 %v418_v44 }
 0x1b1   : > { %v417_v45 = vpop.xlane.xlu2 %416 }
 0x1b2   : > { %v421_v46 = vsub.f32 %v412_v36, %v417_v45 }
 0x1b4   : > { %v423_v47 = vmul.f32 1.442695, %v421_v46 }
 0x1b6   : > { %567 = vpow2.f32 %v423_v47 }
 0x1b9   : > { %v420_v48 = vpop.xlane.xlu2 %419 }
 0x1ba   : > { %v422_v49 = vsub.f32 %v413_v42, %v420_v48 }
 0x1bc   : > { %v568_v50 = vpop.eup %567  ;;  %v425_v51 = vmul.f32 1.442695, %v422_v49 }
 0x1bd   : > { %v427_v52 = vsel %vm414_vm2, %v568_v50, 0.0 }
 0x1be   : > { %569 = vpow2.f32 %v425_v51  ;;  %428 = vadd.xlane.f32.xlu0 %v427_v52 }
 0x1c4   : > { %v570_v53 = vpop.eup %569 }
 0x1c5   : > { %v430_v54 = vsel %vm414_vm2, %v570_v53, 0.0  ;;  %v433_v55 = vpack.c.bf16 %v570_v53, %v568_v50 }
 0x1c6   : > { %431 = vadd.xlane.f32.xlu2 %v430_v54 }
 0x1c7   : > { %548 = vmatmul.msk.bf16.vlgmr.msra.gmra.mxu3 %vm414_vm2, %v433_v55 }
 0x231   : > { %v429_v56 = vpop.xlane.xlu0 %428 }
 0x232   : > { %571 = vrcp.f32 %v429_v56 }
 0x238   : > { %v572_v59 = vpop.eup %571 }
 0x239   : > { %v432_v57 = vpop.xlane.xlu2 %431 }
 0x23a   : > { %573 = vrcp.f32 %v432_v57 }
 0x240   : > { %v574_v63 = vpop.eup %573 }
 0x24a   : > { %v446_v60 = vpop.f32.mrf.mxu3 }
 0x24b   : > { %v453_v61 = vmul.f32 %v572_v59, %v446_v60 }
 0x24d   : > { %v459_v62 = vadd.f32 %v566_v58, %v453_v61 }
 0x24f   : > { %462 = vst.msk [vmem:[%s275_s30] sm:$0xff] %vm461_vm4, %v459_v62 }
 0x252   : > { %v448_v0 = vpop.f32.mrf.mxu3 }
 0x253   : > { %v454_v1 = vmul.f32 %v574_v63, %v448_v0 }
 0x255   : > { %v460_v2 = vadd.f32 %v566_v58, %v454_v1 }
 0x257   : > { %463 = vst.msk [vmem:[%s275_s30 + $0x8] sm:$0xff] %vm461_vm4, %v460_v2 }
 0x258 PF: > { %s16_s21 = sadd.s32 1, %s581_s21  }
 0x259   : > { %p13_p4 = scmp.ge.s32.totalorder %s16_s21, 4  }
 0x25b   :  { %15 = sbr.rel (!%p13_p4) target bundleno = 1 (0x1), region = 77 }

// kernel: gat_pre_forward.2
= control target key start
LH: loop header
LB: loop body
LE: loop exit
PB: predicated region body
PF: predicated region fallthrough
CT: control target
= control target key end

     0   :  { %s901_s27 = smov 0   ;;  %s996_s0 = inlined_call_operand.vmem [shape: f32[32,4], index: 0, kind: input, shape index: {}, may-alias: {0,1}]   ;;  %s997_s1 = inlined_call_operand.vmem [shape: f32[32,4], index: 1, kind: input, shape index: {}, may-alias: {0,1}]   ;;  %s998_s2 = inlined_call_operand.vmem [shape: f32[4,32], index: 2, kind: input, shape index: {}]   ;;  %s999_s3 = inlined_call_operand.vmem [shape: f32[1,32], index: 3, kind: input, shape index: {}]   ;;  %s1000_s4 = inlined_call_operand.vmem [shape: f32[32,16], index: 4, kind: input, shape index: {}]   ;;  %s1001_s5 = inlined_call_operand.vmem [shape: f32[32,4], index: 5, kind: input, shape index: {}]   ;;  %s1002_s6 = inlined_call_operand.vmem [shape: f32[1,16], index: 6, kind: input, shape index: {}]   ;;  %s1003_s7 = inlined_call_operand.vmem [shape: bf16[32,32], index: 7, kind: input, shape index: {}]   ;;  %s1004_s8 = inlined_call_operand.vmem [shape: f32[32,16], index: 8, kind: output, shape index: {}]  }
   0x1 LB: > { %s772_s28 = sadd.s32 4294967295, %s850_s27   ;;  %p776_p0 = scmp.ge.s32.totalorder %s850_s27, 1  ;;  %s850_s27 = sphi %s901_s27, %s18_s27  }
   0x2   : > { %p274_p1 = scmp.lt.s32.totalorder %s850_s27, 3 }
   0x4   : > { %p275_p2 = pnand %p776_p0, %p274_p1 }
   0x5   : > { %s777_s13 = sshll.u32 (!%p275_p2), %s772_s28, 1  ;;  %s854_s21 = smov (!%p275_p2), 120  }
   0x6   : > { %278 = sbr.rel (%p275_p2) target bundleno = 864 (0x360), region = 52  ;;  %p314_p3 = scmp.lt.s32.totalorder (!%p275_p2), %s777_s13, 3 }
   0x7   : > { %s855_s29 = smov (!%p275_p2), 8  }
   0xb   : > { %v338_v0 = vld [vmem:[%s998_s2] sm:$0xf]  ;;  %vm353_vm0 = vcmask 1041408   ;;  %v333_v2 = vld [vmem:[%s996_s0 + $0x8] sm:$0xff]  ;;  %vm346_vm1 = vcmask 31744   ;;  %s1006_s13 = smov (!%p314_p3, %s777_s13), 3 }
   0xc   : > { %v332_v1 = vld [vmem:[%s996_s0] sm:$0xff]  ;;  %v339_v3 = vpack.c.bf16 %v338_v0, %v338_v0  ;;  %s778_s14 = sshll.u32 %s1006_s13, 3  ;;  %v334_v9 = vld [vmem:[%s996_s0 + $0x10] sm:$0xff]  ;;  %v335_v10 = vld [vmem:[%s996_s0 + $0x18] sm:$0xff]  ;;  %vm415_vm2 = vcmask 261120   ;;  %v852_v46 = vmov 3  }
   0xd   : > { %v341_v5 = vpack.c.bf16 %v333_v2, %v332_v1  ;;  %s317_s17 = scalar_lea.vmem %s997_s1, %s778_s14  ;;  %v342_v11 = vpack.c.bf16 %v335_v10, %v334_v9  ;;  %v405_v12 = vld [vmem:[%s1000_s4 + $0x10] sm:$0xff]  ;;  %v406_v13 = vld [vmem:[%s1000_s4 + $0x18] sm:$0xff]  ;;  %v403_v18 = vld [vmem:[%s1000_s4] sm:$0xff]  ;;  %816 = vset.pattern.permute.xlu0 %v852_v46  ;;  %v853_v47 = vmov 2   ;;  %s780_s22 = sshll.u32 %s1006_s13, 2  ;;  %vm698_vm9 = vcmask 64512  }
   0xe   : > { %v355_v4 = vsel %vm353_vm0, %v339_v3, 0  ;;  %v336_v6 = vld [vmem:[%s317_s17] sm:$0xff]  ;;  %v337_v7 = vld [vmem:[%s317_s17 + $0x8] sm:$0xff]  ;;  %v411_v14 = vld [vmem:[%s1001_s5 + $0x10] sm:$0xff]  ;;  %v408_v15 = vpack.c.bf16 %v406_v13, %v405_v12  ;;  %817 = vset.pattern.permute.xlu2 %v853_v47  ;;  %s323_s25 = scalar_lea.vmem %s1003_s7, %s780_s22  ;;  %s329_s10 = scalar_lea.vmem %s1004_s8, %s778_s14  ;;  %vm701_vm10 = vcmask 130048  }
   0xf   : > { %364 = vmatpush.bf16.msra.mxu0 %v355_v4  ;;  %391 = vmatpush.bf16.msra.mxu1 %v355_v4  ;;  %v380_v8 = vpack.c.bf16 %v337_v7, %v336_v6  ;;  %v412_v16 = vld [vmem:[%s1001_s5 + $0x18] sm:$0xff]  ;;  %v404_v19 = vld [vmem:[%s1000_s4 + $0x8] sm:$0xff]  ;;  %v409_v20 = vld [vmem:[%s1001_s5] sm:$0xff] }
  0x10   : > { %v414_v17 = vpack.c.bf16 %v412_v16, %v411_v14  ;;  %428 = vmatpush.bf16.msra.mxu2 %v408_v15  ;;  %v407_v21 = vpack.c.bf16 %v404_v19, %v403_v18  ;;  %v410_v22 = vld [vmem:[%s1001_s5 + $0x8] sm:$0xff]  ;;  %v818_v25 = vld [vmem:[%s999_s3] ss:$0 sm:$0xff] }
  0x11   : > { %v413_v23 = vpack.c.bf16 %v410_v22, %v409_v20  ;;  %v800_v9 = vld [vmem:[%s323_s25] sm:$0xff]  }
  0x12   : > { %783 = vmatmul.msk.bf16.vlgmr.msra.gmra.mxu0 %vm346_vm1, %v341_v5  ;;  %785 = vmatmul.msk.bf16.vlgmr.msra.gmra.mxu1 %vm346_vm1, %v380_v8  ;;  %v801_v14 = vunpack.c.l.bf16 %v800_v9  ;;  %v802_v15 = vunpack.c.h.bf16 %v800_v9 }
  0x13   : > { %451 = vmatpush.bf16.msra.mxu3 %v414_v17  ;;  %473 = vmatpush.bf16.msrb.mxu1 %v414_v17 }
  0x14   : > { %429 = vmatpush.bf16.msra.mxu2 %v407_v21 }
  0x17   : > { %452 = vmatpush.bf16.msra.mxu3 %v413_v23  ;;  %474 = vmatpush.bf16.msrb.mxu1 %v413_v23 }
  0x22   : > { %784 = vmatmul.msk.bf16.gmra.mxu0 %vm346_vm1, %v342_v11 }
  0x8f   : > { %v366_v24 = vpop.f32.mrf.mxu0  ;;  %v393_v26 = vpop.f32.mrf.mxu1 }
  0x90   : > { %v367_v27 = vadd.f32 %v818_v25, %v366_v24  ;;  %v394_v30 = vadd.f32 %v818_v25, %v393_v26 }
  0x92   : > { %v376_v31 = vmax.f32 %v367_v27, 0.0  ;;  %v398_v35 = vmax.f32 %v394_v30, 0.0 }
  0x97   : > { %v368_v28 = vpop.f32.mrf.mxu0  ;;  %v395_v33 = vpop.f32.mrf.mxu1 }
  0x98   : > { %v369_v29 = vadd.f32 %v818_v25, %v368_v28  ;;  %v396_v36 = vadd.f32 %v818_v25, %v395_v33 }
  0x9a   : > { %v377_v32 = vmax.f32 %v369_v29, 0.0  ;;  %v399_v37 = vmax.f32 %v396_v36, 0.0 }
  0x9c   : > { %v400_v34 = vpack.c.bf16 %v377_v32, %v376_v31  ;;  %v402_v39 = vpack.c.bf16 %v399_v37, %v398_v35 }
  0x9e   : > { %786 = vmatmul.msk.bf16.vlgmr.msra.gmra.mxu2 %vm415_vm2, %v400_v34  ;;  %788 = vmatmul.msk.bf16.vlgmr.msra.gmra.mxu3 %vm415_vm2, %v400_v34 }
  0x9f   : > { %v371_v38 = vpop.f32.mrf.mxu0  ;;  %790 = vmatmul.msk.bf16.vlgmr.msrb.gmra.mxu1 %vm415_vm2, %v402_v39 }
  0xa0   : > { %v372_v40 = vadd.f32 %v818_v25, %v371_v38 }
  0xa2   : > { %v378_v43 = vmax.f32 %v372_v40, 0.0 }
  0xa7   : > { %v373_v41 = vpop.f32.mrf.mxu0 }
  0xa8   : > { %v374_v42 = vadd.f32 %v818_v25, %v373_v41 }
  0xaa   : > { %v379_v44 = vmax.f32 %v374_v42, 0.0 }
  0xac   : > { %v401_v45 = vpack.c.bf16 %v379_v44, %v378_v43 }
  0xae   : > { %787 = vmatmul.msk.bf16.gmra.mxu2 %vm415_vm2, %v401_v45  ;;  %789 = vmatmul.msk.bf16.gmra.mxu3 %vm415_vm2, %v401_v45 }
 0x11c   : > { %v476_v48 = vpop.f32.mrf.mxu1 }
 0x11d   : > { %519 = vperm.xlu2 %817, %v476_v48   ;;  %609 = vperm.xlu0 %816, %v476_v48  }
 0x121   : > { %v431_v49 = vpop.f32.mrf.mxu2  ;;  %v454_v50 = vpop.f32.mrf.mxu3 }
 0x122   : > { %481 = vxpose.xlu1.b32.start [1/4] (short) (narrow) %v454_v50, 8  ;;  %v441_v61 = vpack.c.bf16 %v431_v49, %v431_v49 }
 0x124   : > { %v478_v51 = vpop.f32.mrf.mxu1  ;;  %v561_v2 = vunpack.c.l.b16 %v441_v61 }
 0x125   : > { %524 = vperm.xlu2 %817, %v478_v51   ;;  %613 = vperm.xlu0 %816, %v478_v51  }
 0x129   : > { %v433_v52 = vpop.f32.mrf.mxu2  ;;  %v456_v53 = vpop.f32.mrf.mxu3 }
 0x12a   : > { %482 = vxpose.xlu1.b32.cont [2/4] (short) (narrow) %v456_v53, 8  ;;  %v442_v59 = vpack.c.bf16 %v433_v52, %v433_v52 }
 0x12c   : > { %v562_v0 = vunpack.c.l.b16 %v442_v59 }
 0x12e   : > { %v565_v3 = vpack.c.b16 %v562_v0, %v561_v2 }
 0x131   : > { %v436_v54 = vpop.f32.mrf.mxu2  ;;  %v459_v55 = vpop.f32.mrf.mxu3 }
 0x132   : > { %483 = vxpose.xlu1.b32.cont [3/4] (short) (narrow) %v459_v55, 8  ;;  %v443_v56 = vpack.c.bf16 %v436_v54, %v436_v54 }
 0x134   : > { %v563_v62 = vunpack.c.l.b16 %v443_v56 }
 0x139   : > { %v438_v57 = vpop.f32.mrf.mxu2  ;;  %v461_v58 = vpop.f32.mrf.mxu3 }
 0x13a   : > { %v444_v60 = vpack.c.bf16 %v438_v57, %v438_v57  ;;  %484 = vxpose.xlu1.b32.end [4/4] (short) (narrow) %v461_v58, 8  ;;  %v819_v57 = vld [vmem:[%s1002_s6] ss:$0 sm:$0xff] }
 0x13c   : > { %v564_v63 = vunpack.c.l.b16 %v444_v60 }
 0x13e   : > { %v566_v1 = vpack.c.b16 %v564_v63, %v563_v62 }
 0x140   : > { %578 = vmatpush.bf16.msrb.mxu0 %v566_v1 }
 0x144   : > { %579 = vmatpush.bf16.msrb.mxu0 %v565_v3 }
 0x177   : > { %v520_v5 = vpop.permute.xlu2 %519 }
 0x17f   : > { %v525_v23 = vpop.permute.xlu2 %524 }
 0x18f   : > { %v610_v4 = vpop.permute.xlu0 %609 }
 0x194   : > { %648 = vrot.lane.b32.xlu1 %v566_v1, %s854_s21 }
 0x197   : > { %v614_v10 = vpop.permute.xlu0 %613 }
 0x1c6   : > { %v497_v6 = vpop.trf.xlu1 }
 0x1c7   : > { %v527_v7 = vperm.slane %v497_v6, 0  ;;  %v616_v8 = vperm.slane %v497_v6, 1 }
 0x1c9   : > { %v528_v11 = vadd.f32 %v527_v7, %v520_v5  ;;  %v617_v12 = vadd.f32 %v616_v8, %v610_v4  ;;  %v618_v13 = vadd.f32 %v616_v8, %v614_v10  ;;  %v529_v26 = vadd.f32 %v527_v7, %v525_v23 }
 0x1cb   : > { %vm619_vm3 = vcmp.gt.f32.partialorder %v617_v12, 0.0  ;;  %v621_v16 = vmul.f32 0.2, %v617_v12  ;;  %vm620_vm4 = vcmp.gt.f32.partialorder %v618_v13, 0.0  ;;  %v622_v17 = vmul.f32 0.2, %v618_v13 }
 0x1cc   : > { %v532_v20 = vmul.f32 0.2, %v528_v11  ;;  %vm530_vm5 = vcmp.gt.f32.partialorder %v528_v11, 0.0  ;;  %v533_v29 = vmul.f32 0.2, %v529_v26  ;;  %vm531_vm6 = vcmp.gt.f32.partialorder %v529_v26, 0.0 }
 0x1cd   : > { %v623_v18 = vsel %vm619_vm3, %v617_v12, %v621_v16  ;;  %v624_v19 = vsel %vm620_vm4, %v618_v13, %v622_v17 }
 0x1ce   : > { %v625_v21 = vadd.f32 %v801_v14, %v623_v18  ;;  %v626_v22 = vadd.f32 %v802_v15, %v624_v19  ;;  %v534_v27 = vsel %vm530_vm5, %v528_v11, %v532_v20  ;;  %v535_v31 = vsel %vm531_vm6, %v529_v26, %v533_v29 }
 0x1cf   : > { %v536_v28 = vadd.f32 %v801_v14, %v534_v27  ;;  %v537_v32 = vadd.f32 %v802_v15, %v535_v31 }
 0x1d0   : > { %v627_v24 = vsel %vm415_vm2, %v625_v21, -inf  ;;  %v630_v25 = vsel %vm415_vm2, %v626_v22, -inf }
 0x1d1   : > { %628 = vmax.xlane.f32.xlu0 %v627_v24  ;;  %631 = vmax.xlane.f32.xlu2 %v630_v25  ;;  %v538_v30 = vsel %vm415_vm2, %v536_v28, -inf  ;;  %v541_v33 = vsel %vm415_vm2, %v537_v32, -inf }
 0x1d9   : > { %539 = vmax.xlane.f32.xlu0 %v538_v30 }
 0x1e1   : > { %542 = vmax.xlane.f32.xlu0 %v541_v33 }
 0x1e9   : > { %646 = vrot.lane.b32.xlu2 %v565_v3, %s854_s21 }
 0x206   : > { %v649_v34 = vpop.permute.xlu1 %648 }
 0x207   : > { %661 = vmatpush.bf16.msra.mxu1 %v649_v34 }
 0x244   : > { %v632_v35 = vpop.xlane.xlu2 %631  ;;  %v629_v36 = vpop.xlane.xlu0 %628 }
 0x245   : > { %v634_v37 = vsub.f32 %v626_v22, %v632_v35  ;;  %v633_v38 = vsub.f32 %v625_v21, %v629_v36 }
 0x247   : > { %v637_v39 = vmul.f32 1.442695, %v634_v37  ;;  %v635_v40 = vmul.f32 1.442695, %v633_v38 }
 0x249   : > { %820 = vpow2.f32 %v637_v39 }
 0x24a   : > { %822 = vpow2.f32 %v635_v40 }
 0x24c   : > { %v647_v41 = vpop.permute.xlu2 %646  ;;  %v540_v42 = vpop.xlane.xlu0 %539 }
 0x24d   : > { %662 = vmatpush.bf16.msra.mxu1 %v647_v41  ;;  %v544_v45 = vsub.f32 %v536_v28, %v540_v42 }
 0x24f   : > { %v821_v43 = vpop.eup %820  ;;  %v546_v49 = vmul.f32 1.442695, %v544_v45 }
 0x250   : > { %v823_v44 = vpop.eup %822  ;;  %v642_v46 = vsel %vm415_vm2, %v821_v43, 0.0 }
 0x251   : > { %v645_v47 = vpack.c.bf16 %v821_v43, %v823_v44  ;;  %643 = vadd.xlane.f32.xlu2 %v642_v46  ;;  %v639_v48 = vsel %vm415_vm2, %v823_v44, 0.0  ;;  %824 = vpow2.f32 %v546_v49 }
 0x252   : > { %640 = vadd.xlane.f32.xlu0 %v639_v48 }
 0x253   : > { %794 = vmatmul.msk.bf16.vlgmr.msra.gmra.mxu1 %vm415_vm2, %v645_v47 }
 0x254   : > { %v543_v50 = vpop.xlane.xlu0 %542 }
 0x255   : > { %v545_v51 = vsub.f32 %v537_v32, %v543_v50 }
 0x257   : > { %v548_v52 = vmul.f32 1.442695, %v545_v51  ;;  %v825_v53 = vpop.eup %824 }
 0x258   : > { %v550_v58 = vsel %vm415_vm2, %v825_v53, 0.0 }
 0x259   : > { %826 = vpow2.f32 %v548_v52 }
 0x25f   : > { %v827_v54 = vpop.eup %826 }
 0x260   : > { %v553_v55 = vsel %vm415_vm2, %v827_v54, 0.0  ;;  %v556_v56 = vpack.c.bf16 %v827_v54, %v825_v53 }
 0x261   : > { %554 = vadd.xlane.f32.xlu1 %v553_v55 }
 0x262   : > { %791 = vmatmul.msk.bf16.vlgmr.msrb.gmra.mxu0 %vm415_vm2, %v556_v56 }
 0x266   : > { %673 = vrot.lane.b32.xlu0 %v819_v57, %s854_s21 }
 0x290   : > { %551 = vadd.xlane.f32.xlu0 %v550_v58 }
 0x2c4   : > { %v644_v60 = vpop.xlane.xlu2 %643 }
 0x2c5   : > { %v641_v59 = vpop.xlane.xlu0 %640 }
 0x2c6   : > { %828 = vrcp.f32 %v641_v59 }
 0x2c7   : > { %830 = vrcp.f32 %v644_v60 }
 0x2cc   : > { %v829_v62 = vpop.eup %828 }
 0x2cd   : > { %v831_v0 = vpop.eup %830 }
 0x2d0   : > { %v664_v61 = vpop.f32.mrf.mxu1 }
 0x2d1   : > { %v671_v63 = vmul.f32 %v829_v62, %v664_v61 }
 0x2d4   : > { %v555_v23 = vpop.xlane.xlu1 %554 }
 0x2d8   : > { %v666_v1 = vpop.f32.mrf.mxu1  ;;  %v674_v2 = vpop.permute.xlu0 %673 }
 0x2d9   : > { %v672_v3 = vmul.f32 %v831_v0, %v666_v1  ;;  %v676_v4 = vadd.f32 %v674_v2, %v671_v63 }
 0x2db   : > { %v677_v5 = vadd.f32 %v674_v2, %v672_v3  ;;  %v680_v6 = vmin.f32 %v676_v4, 0.0  ;;  %vm678_vm7 = vcmp.gt.f32.partialorder %v676_v4, 0.0 }
 0x2dd   : > { %v681_v7 = vmin.f32 %v677_v5, 0.0  ;;  %v682_v8 = vmul.f32 1.442695, %v680_v6  ;;  %vm679_vm8 = vcmp.gt.f32.partialorder %v677_v5, 0.0 }
 0x2df   : > { %832 = vpow2.f32 %v682_v8  ;;  %v684_v9 = vmul.f32 1.442695, %v681_v7  ;;  %v581_v18 = vpop.f32.mrf.mxu0 }
 0x2e1   : > { %834 = vpow2.f32 %v684_v9 }
 0x2e5   : > { %v833_v10 = vpop.eup %832 }
 0x2e6   : > { %v795_v11 = vadd.f32 -1.0, %v833_v10 }
 0x2e7   : > { %v835_v12 = vpop.eup %834  ;;  %v583_v25 = vpop.f32.mrf.mxu0 }
 0x2e8   : > { %v688_v13 = vsel %vm678_vm7, %v676_v4, %v795_v11  ;;  %v796_v14 = vadd.f32 -1.0, %v835_v12 }
 0x2e9   : > { %692 = vrot.lane.b32.xlu2 %v688_v13, %s855_s29 }
 0x2ea   : > { %v689_v15 = vsel %vm679_vm8, %v677_v5, %v796_v14 }
 0x2eb   : > { %694 = vrot.lane.b32.xlu0 %v689_v15, %s855_s29 }
 0x303   : > { %v552_v16 = vpop.xlane.xlu0 %551 }
 0x304   : > { %836 = vrcp.f32 %v552_v16 }
 0x30a   : > { %v837_v17 = vpop.eup %836 }
 0x30b   : > { %v588_v19 = vmul.f32 %v837_v17, %v581_v18 }
 0x30d   : > { %v594_v20 = vadd.f32 %v819_v57, %v588_v19 }
 0x30f   : > { %v598_v21 = vmin.f32 %v594_v20, 0.0  ;;  %vm596_vm11 = vcmp.gt.f32.partialorder %v594_v20, 0.0 }
 0x311   : > { %v600_v22 = vmul.f32 1.442695, %v598_v21 }
 0x313   : > { %838 = vpow2.f32 %v600_v22 }
 0x314   : > { %840 = vrcp.f32 %v555_v23 }
 0x319   : > { %v839_v24 = vpop.eup %838 }
 0x31a   : > { %v841_v26 = vpop.eup %840  ;;  %v792_v27 = vadd.f32 -1.0, %v839_v24 }
 0x31b   : > { %v589_v28 = vmul.f32 %v841_v26, %v583_v25 }
 0x31c   : > { %v606_v30 = vsel %vm596_vm11, %v594_v20, %v792_v27 }
 0x31d   : > { %v595_v31 = vadd.f32 %v819_v57, %v589_v28 }
 0x31f   : > { %v599_v33 = vmin.f32 %v595_v31, 0.0  ;;  %vm597_vm12 = vcmp.gt.f32.partialorder %v595_v31, 0.0 }
 0x321   : > { %v602_v34 = vmul.f32 1.442695, %v599_v33 }
 0x323   : > { %842 = vpow2.f32 %v602_v34 }
 0x329   : > { %v843_v35 = vpop.eup %842 }
 0x32a   : > { %v793_v36 = vadd.f32 -1.0, %v843_v35 }
 0x32c   : > { %v607_v37 = vsel %vm597_vm12, %v595_v31, %v793_v36 }
 0x343   : > { %v693_v29 = vpop.permute.xlu2 %692 }
 0x344   : > { %v699_v32 = vsel %vm698_vm9, %v606_v30, %v693_v29 }
 0x345   : > { %702 = vst.msk [vmem:[%s329_s10] sm:$0xff] %vm701_vm10, %v699_v32 }
 0x35d   : > { %v695_v38 = vpop.permute.xlu0 %694 }
 0x35e   : > { %v700_v39 = vsel %vm698_vm9, %v607_v37, %v695_v38 }
 0x35f   : > { %703 = vst.msk [vmem:[%s329_s10 + $0x8] sm:$0xff] %vm701_vm10, %v700_v39 }
 0x360 PF: > { %s18_s27 = sadd.s32 1, %s850_s27  }
 0x361   : > { %p15_p4 = scmp.ge.s32.totalorder %s18_s27, 4  }
 0x363   :  { %17 = sbr.rel (!%p15_p4) target bundleno = 1 (0x1), region = 85 }

</bundles_post_ra>
